<compile_context>
chip_gen: v5e
topology: v5e:2x2
jax: 0.10.0
libtpu: 0.0.40
codegen_flags: <defaults>
</compile_context>

<pallas_src>
import jax
import jax.numpy as jnp
from jax.experimental import pallas as pl
from jax.experimental.pallas import tpu as pltpu

LANE = 128
SUBLANE = 8


def get_1d_out_len(in_len, filter_size, stride):
    return (in_len - filter_size) // stride + 1


def _round_up(n, m):
    return ((n + m - 1) // m) * m


def _layer_cfgs(seq_len, seq_feat, num_filters, filter_sizes, strides):
    """Static per-layer geometry + padded widths."""
    cfgs = []
    L_in, c_in = seq_len, seq_feat
    for f, fs, st in zip(num_filters, filter_sizes, strides):
        L_out = get_1d_out_len(L_in, fs, st)
        cfgs.append(dict(L_in=L_in, L_out=L_out, Lp=_round_up(L_out, SUBLANE),
                         fs=fs, stride=st, c_in=c_in, f=f,
                         K_pad=_round_up(fs * c_in, LANE),
                         f_pad=_round_up(f, LANE)))
        L_in, c_in = L_out, f
    return cfgs


# ---------------------------------------------------------------------------
# Fused Pallas kernel: all Conv1dLayers (conv + train-mode BN + ReLU) + w_pooling.
# ---------------------------------------------------------------------------
def _make_fused_kernel(B, cfgs):
    nl = len(cfgs)

    def kernel(*refs):
        lhs0_ref = refs[0]                      # (B, Lp0, K_pad0) wrapper im2col
        lrefs = refs[1:1 + 3 * nl]              # (w, gamma, beta) per layer
        P_ref = refs[1 + 3 * nl]                # (B, B*Lp_last) pooling matrix
        pb_ref = refs[2 + 3 * nl]               # (1, 1) pooling bias (SMEM)
        out_ref = refs[3 + 3 * nl]              # (B, f_pad_last)
        scr = refs[4 + 3 * nl:]
        y_scr = scr[:nl]                        # (B, Lp_i, f_pad_i) per layer
        lhs_scr = scr[nl:]                      # (B, Lp_i, K_pad_i) for layers 1..nl-1

        for i, cfg in enumerate(cfgs):
            L_out, Lp = cfg['L_out'], cfg['Lp']
            K_pad, f_pad = cfg['K_pad'], cfg['f_pad']
            last = (i == nl - 1)
            w_ref, g_ref, b_ref = lrefs[3 * i], lrefs[3 * i + 1], lrefs[3 * i + 2]
            lhs_ref = lhs0_ref if i == 0 else lhs_scr[i - 1]
            M = B * Lp

            # Conv as ONE MXU matmul per layer: batch folded into M, taps folded
            # into K (lane-packed im2col).
            y = jnp.dot(lhs_ref[...].reshape(M, K_pad), w_ref[...],
                        preferred_element_type=jnp.float32)          # (M, f_pad)
            # Raw conv output goes straight to scratch (no live per-batch blocks).
            y_scr[i][...] = y.reshape(B, Lp, f_pad)

            # Single-pass BN batch statistics.  Padded rows of the im2col LHS are
            # zero, so they contribute nothing to the sums — divide by the REAL
            # row count.  Conv bias is dropped (cancels under the mean subtraction).
            inv_n = 1.0 / float(B * L_out)
            s1 = jnp.sum(y, axis=0, keepdims=True)                   # (1, f_pad)
            s2 = jnp.sum(y * y, axis=0, keepdims=True)
            mean = s1 * inv_n
            var = jnp.maximum(s2 * inv_n - mean * mean, 0.0)         # clamp: no NaN
            inv_std = jax.lax.rsqrt(var + 1e-5)                      # EUP slot
            scale2 = g_ref[...] * inv_std                            # (1, f_pad)
            shift2 = b_ref[...] - mean * scale2
            scale = scale2.reshape(1, 1, f_pad)
            shift = shift2.reshape(1, 1, f_pad)

            # Second pass: scale/shift + ReLU on the scratch-resident conv output.
            a = jnp.maximum(y_scr[i][...] * scale + shift, 0.0)      # (B, Lp, f_pad)

            if not last:
                y_scr[i][...] = a                                    # normalized, in place
                ncfg = cfgs[i + 1]
                fs_n, st_n, c_n = ncfg['fs'], ncfg['stride'], ncfg['c_in']
                L_n = ncfg['L_out']
                span = (L_n - 1) * st_n + 1
                nxt = lhs_scr[i]
                # Zero once so pad rows/lanes cannot pollute the next layer's stats.
                nxt[...] = jnp.zeros_like(nxt)
                # In-kernel im2col for the next layer: batch-wide tap windows,
                # lane-packed tap-major / channel-minor into the wider LHS scratch.
                # TODO(synk): for stride>1 inner layers, de-interleave the producer's
                # row layout so these reads are contiguous instead of sublane-strided.
                taps = [y_scr[i][:, k:k + span:st_n, 0:c_n] for k in range(fs_n)]
                nxt[:, 0:L_n, 0:fs_n * c_n] = jnp.concatenate(taps, axis=-1)
            else:
                # w_pooling as a single M=B MXU contraction with a block-structured
                # pooling matrix (zeros on pad rows / other batches' rows).
                pooled = jnp.dot(P_ref[...], a.reshape(M, f_pad),
                                 preferred_element_type=jnp.float32)  # (B, f_pad)
                out_ref[...] = pooled + pb_ref[0, 0]

    return kernel


# ---------------------------------------------------------------------------
# One-time, x-independent parameter packing (NOT on the per-step path).
# ---------------------------------------------------------------------------
def pack_params(layer_params, pool_params, cfgs, batch):
    packed = []
    for cfg, (w, b, gamma, beta) in zip(cfgs, layer_params):
        K = cfg['fs'] * cfg['c_in']
        packed.append(jnp.pad(w.astype(jnp.float32),
                              ((0, cfg['K_pad'] - K), (0, cfg['f_pad'] - cfg['f']))))
        # gamma/beta padded with ZEROS so padded feature lanes stay exactly zero
        # through BN + ReLU (scale = shift = 0 on pad lanes).
        packed.append(jnp.pad(gamma.astype(jnp.float32),
                              ((0, 0), (0, cfg['f_pad'] - cfg['f']))))
        packed.append(jnp.pad(beta.astype(jnp.float32),
                              ((0, 0), (0, cfg['f_pad'] - cfg['f']))))
        # Conv bias `b` intentionally dropped: it cancels exactly under train-mode BN.

    wp, bp = pool_params
    last = cfgs[-1]
    # Block-structured pooling matrix: P[b, b*Lp + t] = w[t] for real rows, else 0.
    P = jnp.zeros((batch, batch * last['Lp']), jnp.float32)
    wvec = wp.reshape(-1).astype(jnp.float32)
    for bi in range(batch):
        off = bi * last['Lp']
        P = P.at[bi, off:off + last['L_out']].set(wvec)
    packed.append(P)
    packed.append(bp.reshape(1, 1).astype(jnp.float32))
    return packed


# ---------------------------------------------------------------------------
# Forward wrapper: only x-dependent work (layer-0 im2col) happens per call.
# ---------------------------------------------------------------------------
def conv1d_ch_forward(x, cfgs, packed):
    """Conv1dCH forward.  x: (B, seq_len, seq_feat) -> (B, num_filters[-1])."""
    B = x.shape[0]
    cfg0 = cfgs[0]

    # Layer-0 im2col on the UNPADDED input (no 32x lane-padding HBM amplification);
    # pad fs*c_in -> 128 lanes and L_out -> multiple-of-8 rows once.
    fs0, st0, c0 = cfg0['fs'], cfg0['stride'], cfg0['c_in']
    L0, Lp0 = cfg0['L_out'], cfg0['Lp']
    span0 = (L0 - 1) * st0 + 1
    taps = [x[:, k:k + span0:st0, :] for k in range(fs0)]
    lhs0 = jnp.concatenate(taps, axis=-1).astype(jnp.float32)     # (B, L0, fs0*c0)
    lhs0 = jnp.pad(lhs0, ((0, 0), (0, Lp0 - L0), (0, cfg0['K_pad'] - fs0 * c0)))

    inputs = [lhs0] + list(packed)

    vmem = pl.BlockSpec(memory_space=pltpu.MemorySpace.VMEM)
    smem = pl.BlockSpec(memory_space=pltpu.MemorySpace.SMEM)

    scratch_shapes = (
        [pltpu.VMEM((B, c['Lp'], c['f_pad']), jnp.float32) for c in cfgs]
        + [pltpu.VMEM((B, c['Lp'], c['K_pad']), jnp.float32) for c in cfgs[1:]])

    # Explicit VMEM budget: actual residency (inputs + output + scratch) + headroom.
    resident = sum(int(a.size) * a.dtype.itemsize for a in inputs)
    resident += B * cfgs[-1]['f_pad'] * 4
    resident += sum(B * c['Lp'] * c['f_pad'] * 4 for c in cfgs)
    resident += sum(B * c['Lp'] * c['K_pad'] * 4 for c in cfgs[1:])
    vmem_limit = min(2 * resident + (16 << 20), 100 << 20)

    out = pl.pallas_call(
        _make_fused_kernel(B, cfgs),
        out_shape=jax.ShapeDtypeStruct((B, cfgs[-1]['f_pad']), jnp.float32),
        in_specs=[vmem] * (len(inputs) - 1) + [smem],
        out_specs=vmem,
        scratch_shapes=scratch_shapes,
        compiler_params=pltpu.CompilerParams(vmem_limit_bytes=vmem_limit),
    )(*inputs)
    return out[:, :cfgs[-1]['f']]


# ---------------------------------------------------------------------------
# Deterministic parameter construction (shapes from Conv1dCH.__init__)
# ---------------------------------------------------------------------------
def init_params(key, seq_feat, seq_len, num_filters, filter_sizes, strides):
    seq_feats = [seq_feat] + num_filters[:-1]
    conv_outs = []
    for i in range(len(filter_sizes)):
        prev = seq_len if i == 0 else conv_outs[-1]
        conv_outs.append(get_1d_out_len(prev, filter_sizes[i], strides[i]))

    layer_params = []
    for c_in, nf, fs in zip(seq_feats, num_filters, filter_sizes):
        key, kw, kb = jax.random.split(key, 3)
        fan_in = fs * c_in
        bound = 1.0 / (fan_in ** 0.5)
        # PyTorch conv weight (nf, 1, fs, c_in) -> flattened (fs*c_in, nf),
        # tap-major / channel-minor, matching the im2col lane ordering.
        w = jax.random.uniform(kw, (fan_in, nf), jnp.float32, -bound, bound)
        b = jax.random.uniform(kb, (1, nf), jnp.float32, -bound, bound)
        gamma = jnp.ones((1, nf), jnp.float32)    # BatchNorm1d default weight
        beta = jnp.zeros((1, nf), jnp.float32)    # BatchNorm1d default bias
        layer_params.append((w, b, gamma, beta))

    L_last = conv_outs[-1]
    key, kw, kb = jax.random.split(key, 3)
    bound = 1.0 / (L_last ** 0.5)
    w_pool = jax.random.uniform(kw, (L_last,), jnp.float32, -bound, bound)
    b_pool = jax.random.uniform(kb, (1, 1), jnp.float32, -bound, bound)
    return layer_params, (w_pool, b_pool), conv_outs


# ---------------------------------------------------------------------------
# Pure-JAX reference (same math, conv bias included, no Pallas)
# ---------------------------------------------------------------------------
def _im2col(x, filter_size, stride):
    B, L_in, C = x.shape
    L_out = get_1d_out_len(L_in, filter_size, stride)
    taps = [x[:, k:k + (L_out - 1) * stride + 1:stride, :] for k in range(filter_size)]
    cols = jnp.stack(taps, axis=2)                    # (B, L_out, fs, C)
    return cols.reshape(B * L_out, filter_size * C), L_out


def reference_forward(x, layer_params, pool_params, filter_sizes, strides):
    h = x
    for (w, b, gamma, beta), fs, st in zip(layer_params, filter_sizes, strides):
        Bb = h.shape[0]
        xcol, L_out = _im2col(h, fs, st)
        y = xcol @ w + b
        mean = jnp.mean(y, axis=0, keepdims=True)
        var = jnp.mean(jnp.square(y - mean), axis=0, keepdims=True)
        y = jnp.maximum(gamma * (y - mean) / jnp.sqrt(var + 1e-5) + beta, 0.0)
        h = y.reshape(Bb, L_out, w.shape[-1])
    wp, bp = pool_params
    return jnp.einsum("blf,l->bf", h, wp) + bp


if __name__ == "__main__":
    # Small, consistent shapes: batch=2, seq_len=16, seq_feat=4,
    # two conv layers: num_filters=[8, 6], filter_sizes=[3, 2], strides=[2, 1].
    B, seq_len, seq_feat = 2, 16, 4
    num_filters = [8, 6]
    filter_sizes = [3, 2]
    strides = [2, 1]

    key = jax.random.PRNGKey(0)
    key, kx = jax.random.split(key)
    x = jax.random.normal(kx, (B, seq_len, seq_feat), jnp.float32)

    layer_params, pool_params, conv_outs = init_params(
        key, seq_feat, seq_len, num_filters, filter_sizes, strides)

    cfgs = _layer_cfgs(seq_len, seq_feat, num_filters, filter_sizes, strides)
    packed = pack_params(layer_params, pool_params, cfgs, B)   # one-time padding

    out = conv1d_ch_forward(x, cfgs, packed)
    out = jax.block_until_ready(out)

    ref = reference_forward(x, layer_params, pool_params, filter_sizes, strides)
    ref = jax.block_until_ready(ref)

    assert out.shape == (B, num_filters[-1]), out.shape
    assert jnp.allclose(out, ref, rtol=1e-2, atol=1e-2), (out, ref)

    print("KERNEL_OK")
</pallas_src>

<mosaic_0001>
module attributes {stable_mosaic.version = 11 : i64} {
  func.func @kernel(%arg0: memref<2x8x128xf32, #tpu.memory_space<vmem>>, %arg1: memref<128x128xf32, #tpu.memory_space<vmem>>, %arg2: memref<1x128xf32, #tpu.memory_space<vmem>>, %arg3: memref<1x128xf32, #tpu.memory_space<vmem>>, %arg4: memref<128x128xf32, #tpu.memory_space<vmem>>, %arg5: memref<1x128xf32, #tpu.memory_space<vmem>>, %arg6: memref<1x128xf32, #tpu.memory_space<vmem>>, %arg7: memref<2x16xf32, #tpu.memory_space<vmem>>, %arg8: memref<1x1xf32, #tpu.memory_space<smem>>, %arg9: memref<2x128xf32, #tpu.memory_space<vmem>>, %arg10: memref<2x8x128xf32, #tpu.memory_space<vmem>>, %arg11: memref<2x8x128xf32, #tpu.memory_space<vmem>>, %arg12: memref<2x8x128xf32, #tpu.memory_space<vmem>>) attributes {dimension_semantics = [], scalar_prefetch = 0 : i64, scratch_operands = 3 : i64, tpu.core_type = #tpu.core_type<tc>} {
    %c0 = arith.constant 0 : index
    %c0_0 = arith.constant 0 : index
    %c0_1 = arith.constant 0 : index
    %0 = vector.load %arg0[%c0, %c0_0, %c0_1] : memref<2x8x128xf32, #tpu.memory_space<vmem>>, vector<2x8x128xf32>
    %1 = vector.shape_cast %0 : vector<2x8x128xf32> to vector<16x128xf32>
    %c0_2 = arith.constant 0 : index
    %c0_3 = arith.constant 0 : index
    %2 = vector.load %arg1[%c0_2, %c0_3] : memref<128x128xf32, #tpu.memory_space<vmem>>, vector<128x128xf32>
    %cst = arith.constant dense<0.000000e+00> : vector<16x128xf32>
    %3 = tpu.matmul %1, %2, %cst {dimension_numbers = #tpu.dot_dimension_numbers<[1], [0], [0], [1], [0, 0, 1, 1], [], []>} : vector<16x128xf32>, vector<128x128xf32>, vector<16x128xf32> -> vector<16x128xf32>
    %4 = vector.shape_cast %3 : vector<16x128xf32> to vector<2x8x128xf32>
    %c0_4 = arith.constant 0 : index
    %c0_5 = arith.constant 0 : index
    %c0_6 = arith.constant 0 : index
    %5 = vector.load %arg10[%c0_4, %c0_5, %c0_6] : memref<2x8x128xf32, #tpu.memory_space<vmem>>, vector<2x8x128xf32>
    tpu.vector_store %arg10[%c0_4, %c0_5, %c0_6], %4 {strides = array<i32>} : memref<2x8x128xf32, #tpu.memory_space<vmem>>, vector<2x8x128xf32>,
    %cst_7 = arith.constant dense<0.000000e+00> : vector<128xf32>
    %6 = vector.multi_reduction <add>, %3, %cst_7 [0] : vector<16x128xf32> to vector<128xf32>
    %7 = vector.shape_cast %6 : vector<128xf32> to vector<1x128xf32>
    %8 = arith.mulf %3, %3 : vector<16x128xf32>
    %cst_8 = arith.constant dense<0.000000e+00> : vector<128xf32>
    %9 = vector.multi_reduction <add>, %8, %cst_8 [0] : vector<16x128xf32> to vector<128xf32>
    %10 = vector.shape_cast %9 : vector<128xf32> to vector<1x128xf32>
    %cst_9 = arith.constant 0.0714285746 : f32
    %11 = vector.broadcast %cst_9 : f32 to vector<1x128xf32>
    %12 = arith.mulf %7, %11 : vector<1x128xf32>
    %cst_10 = arith.constant 0.0714285746 : f32
    %13 = vector.broadcast %cst_10 : f32 to vector<1x128xf32>
    %14 = arith.mulf %10, %13 : vector<1x128xf32>
    %15 = arith.mulf %12, %12 : vector<1x128xf32>
    %16 = arith.subf %14, %15 : vector<1x128xf32>
    %cst_11 = arith.constant 0.000000e+00 : f32
    %17 = vector.broadcast %cst_11 : f32 to vector<1x128xf32>
    %18 = arith.maximumf %16, %17 : vector<1x128xf32>
    %cst_12 = arith.constant 9.99999974E-6 : f32
    %19 = vector.broadcast %cst_12 : f32 to vector<1x128xf32>
    %20 = arith.addf %18, %19 : vector<1x128xf32>
    %21 = math.rsqrt %20 : vector<1x128xf32>
    %c0_13 = arith.constant 0 : index
    %c0_14 = arith.constant 0 : index
    %22 = vector.load %arg2[%c0_13, %c0_14] : memref<1x128xf32, #tpu.memory_space<vmem>>, vector<1x128xf32>
    %23 = arith.mulf %22, %21 : vector<1x128xf32>
    %c0_15 = arith.constant 0 : index
    %c0_16 = arith.constant 0 : index
    %24 = vector.load %arg3[%c0_15, %c0_16] : memref<1x128xf32, #tpu.memory_space<vmem>>, vector<1x128xf32>
    %25 = arith.mulf %12, %23 : vector<1x128xf32>
    %26 = arith.subf %24, %25 : vector<1x128xf32>
    %27 = vector.shape_cast %23 : vector<1x128xf32> to vector<1x1x128xf32>
    %28 = vector.shape_cast %26 : vector<1x128xf32> to vector<1x1x128xf32>
    %c0_17 = arith.constant 0 : index
    %c0_18 = arith.constant 0 : index
    %c0_19 = arith.constant 0 : index
    %29 = vector.load %arg10[%c0_17, %c0_18, %c0_19] : memref<2x8x128xf32, #tpu.memory_space<vmem>>, vector<2x8x128xf32>
    %30 = vector.broadcast %27 : vector<1x1x128xf32> to vector<2x8x128xf32>
    %31 = arith.mulf %29, %30 : vector<2x8x128xf32>
    %32 = vector.broadcast %28 : vector<1x1x128xf32> to vector<2x8x128xf32>
    %33 = arith.addf %31, %32 : vector<2x8x128xf32>
    %cst_20 = arith.constant 0.000000e+00 : f32
    %34 = vector.broadcast %cst_20 : f32 to vector<2x8x128xf32>
    %35 = arith.maximumf %33, %34 : vector<2x8x128xf32>
    %c0_21 = arith.constant 0 : index
    %c0_22 = arith.constant 0 : index
    %c0_23 = arith.constant 0 : index
    %36 = vector.load %arg10[%c0_21, %c0_22, %c0_23] : memref<2x8x128xf32, #tpu.memory_space<vmem>>, vector<2x8x128xf32>
    tpu.vector_store %arg10[%c0_21, %c0_22, %c0_23], %35 {strides = array<i32>} : memref<2x8x128xf32, #tpu.memory_space<vmem>>, vector<2x8x128xf32>,
    %cst_24 = arith.constant 0.000000e+00 : f32
    %37 = vector.broadcast %cst_24 : f32 to vector<2x8x128xf32>
    %c0_25 = arith.constant 0 : index
    %c0_26 = arith.constant 0 : index
    %c0_27 = arith.constant 0 : index
    %38 = vector.load %arg12[%c0_25, %c0_26, %c0_27] : memref<2x8x128xf32, #tpu.memory_space<vmem>>, vector<2x8x128xf32>
    tpu.vector_store %arg12[%c0_25, %c0_26, %c0_27], %37 {strides = array<i32>} : memref<2x8x128xf32, #tpu.memory_space<vmem>>, vector<2x8x128xf32>,
    %c0_28 = arith.constant 0 : index
    %c0_29 = arith.constant 0 : index
    %c0_30 = arith.constant 0 : index
    %39 = vector.load %arg10[%c0_28, %c0_29, %c0_30] : memref<2x8x128xf32, #tpu.memory_space<vmem>>, vector<2x6x8xf32>
    %c0_31 = arith.constant 0 : index
    %c1 = arith.constant 1 : index
    %c0_32 = arith.constant 0 : index
    %40 = vector.load %arg10[%c0_31, %c1, %c0_32] : memref<2x8x128xf32, #tpu.memory_space<vmem>>, vector<2x6x8xf32>
    %41 = tpu.concatenate %39, %40 in 2 : vector<2x6x8xf32>, vector<2x6x8xf32> -> vector<2x6x16xf32>
    %c0_33 = arith.constant 0 : index
    %c0_34 = arith.constant 0 : index
    %c0_35 = arith.constant 0 : index
    %42 = vector.load %arg12[%c0_33, %c0_34, %c0_35] : memref<2x8x128xf32, #tpu.memory_space<vmem>>, vector<2x6x16xf32>
    tpu.vector_store %arg12[%c0_33, %c0_34, %c0_35], %41 {strides = array<i32>} : memref<2x8x128xf32, #tpu.memory_space<vmem>>, vector<2x6x16xf32>,
    %c0_36 = arith.constant 0 : index
    %c0_37 = arith.constant 0 : index
    %c0_38 = arith.constant 0 : index
    %43 = vector.load %arg12[%c0_36, %c0_37, %c0_38] : memref<2x8x128xf32, #tpu.memory_space<vmem>>, vector<2x8x128xf32>
    %44 = vector.shape_cast %43 : vector<2x8x128xf32> to vector<16x128xf32>
    %c0_39 = arith.constant 0 : index
    %c0_40 = arith.constant 0 : index
    %45 = vector.load %arg4[%c0_39, %c0_40] : memref<128x128xf32, #tpu.memory_space<vmem>>, vector<128x128xf32>
    %cst_41 = arith.constant dense<0.000000e+00> : vector<16x128xf32>
    %46 = tpu.matmul %44, %45, %cst_41 {dimension_numbers = #tpu.dot_dimension_numbers<[1], [0], [0], [1], [0, 0, 1, 1], [], []>} : vector<16x128xf32>, vector<128x128xf32>, vector<16x128xf32> -> vector<16x128xf32>
    %47 = vector.shape_cast %46 : vector<16x128xf32> to vector<2x8x128xf32>
    %c0_42 = arith.constant 0 : index
    %c0_43 = arith.constant 0 : index
    %c0_44 = arith.constant 0 : index
    %48 = vector.load %arg11[%c0_42, %c0_43, %c0_44] : memref<2x8x128xf32, #tpu.memory_space<vmem>>, vector<2x8x128xf32>
    tpu.vector_store %arg11[%c0_42, %c0_43, %c0_44], %47 {strides = array<i32>} : memref<2x8x128xf32, #tpu.memory_space<vmem>>, vector<2x8x128xf32>,
    %cst_45 = arith.constant dense<0.000000e+00> : vector<128xf32>
    %49 = vector.multi_reduction <add>, %46, %cst_45 [0] : vector<16x128xf32> to vector<128xf32>
    %50 = vector.shape_cast %49 : vector<128xf32> to vector<1x128xf32>
    %51 = arith.mulf %46, %46 : vector<16x128xf32>
    %cst_46 = arith.constant dense<0.000000e+00> : vector<128xf32>
    %52 = vector.multi_reduction <add>, %51, %cst_46 [0] : vector<16x128xf32> to vector<128xf32>
    %53 = vector.shape_cast %52 : vector<128xf32> to vector<1x128xf32>
    %cst_47 = arith.constant 0.0833333358 : f32
    %54 = vector.broadcast %cst_47 : f32 to vector<1x128xf32>
    %55 = arith.mulf %50, %54 : vector<1x128xf32>
    %cst_48 = arith.constant 0.0833333358 : f32
    %56 = vector.broadcast %cst_48 : f32 to vector<1x128xf32>
    %57 = arith.mulf %53, %56 : vector<1x128xf32>
    %58 = arith.mulf %55, %55 : vector<1x128xf32>
    %59 = arith.subf %57, %58 : vector<1x128xf32>
    %cst_49 = arith.constant 0.000000e+00 : f32
    %60 = vector.broadcast %cst_49 : f32 to vector<1x128xf32>
    %61 = arith.maximumf %59, %60 : vector<1x128xf32>
    %cst_50 = arith.constant 9.99999974E-6 : f32
    %62 = vector.broadcast %cst_50 : f32 to vector<1x128xf32>
    %63 = arith.addf %61, %62 : vector<1x128xf32>
    %64 = math.rsqrt %63 : vector<1x128xf32>
    %c0_51 = arith.constant 0 : index
    %c0_52 = arith.constant 0 : index
    %65 = vector.load %arg5[%c0_51, %c0_52] : memref<1x128xf32, #tpu.memory_space<vmem>>, vector<1x128xf32>
    %66 = arith.mulf %65, %64 : vector<1x128xf32>
    %c0_53 = arith.constant 0 : index
    %c0_54 = arith.constant 0 : index
    %67 = vector.load %arg6[%c0_53, %c0_54] : memref<1x128xf32, #tpu.memory_space<vmem>>, vector<1x128xf32>
    %68 = arith.mulf %55, %66 : vector<1x128xf32>
    %69 = arith.subf %67, %68 : vector<1x128xf32>
    %70 = vector.shape_cast %66 : vector<1x128xf32> to vector<1x1x128xf32>
    %71 = vector.shape_cast %69 : vector<1x128xf32> to vector<1x1x128xf32>
    %c0_55 = arith.constant 0 : index
    %c0_56 = arith.constant 0 : index
    %c0_57 = arith.constant 0 : index
    %72 = vector.load %arg11[%c0_55, %c0_56, %c0_57] : memref<2x8x128xf32, #tpu.memory_space<vmem>>, vector<2x8x128xf32>
    %73 = vector.broadcast %70 : vector<1x1x128xf32> to vector<2x8x128xf32>
    %74 = arith.mulf %72, %73 : vector<2x8x128xf32>
    %75 = vector.broadcast %71 : vector<1x1x128xf32> to vector<2x8x128xf32>
    %76 = arith.addf %74, %75 : vector<2x8x128xf32>
    %cst_58 = arith.constant 0.000000e+00 : f32
    %77 = vector.broadcast %cst_58 : f32 to vector<2x8x128xf32>
    %78 = arith.maximumf %76, %77 : vector<2x8x128xf32>
    %c0_59 = arith.constant 0 : index
    %c0_60 = arith.constant 0 : index
    %79 = vector.load %arg7[%c0_59, %c0_60] : memref<2x16xf32, #tpu.memory_space<vmem>>, vector<2x16xf32>
    %80 = vector.shape_cast %78 : vector<2x8x128xf32> to vector<16x128xf32>
    %cst_61 = arith.constant dense<0.000000e+00> : vector<2x128xf32>
    %81 = tpu.matmul %79, %80, %cst_61 {dimension_numbers = #tpu.dot_dimension_numbers<[1], [0], [0], [1], [0, 0, 1, 1], [], []>} : vector<2x16xf32>, vector<16x128xf32>, vector<2x128xf32> -> vector<2x128xf32>
    %c0_62 = arith.constant 0 : index
    %c0_63 = arith.constant 0 : index
    %82 = memref.load %arg8[%c0_62, %c0_63] : memref<1x1xf32, #tpu.memory_space<smem>>
    %83 = vector.broadcast %82 : f32 to vector<2x128xf32>
    %84 = arith.addf %81, %83 : vector<2x128xf32>
    %c0_64 = arith.constant 0 : index
    %c0_65 = arith.constant 0 : index
    %85 = vector.load %arg9[%c0_64, %c0_65] : memref<2x128xf32, #tpu.memory_space<vmem>>, vector<2x128xf32>
    tpu.vector_store %arg9[%c0_64, %c0_65], %84 {strides = array<i32>} : memref<2x128xf32, #tpu.memory_space<vmem>>, vector<2x128xf32>,
    return
  }
}

</mosaic_0001>

<bundles_post_ra>
// kernel: tpu_custom_call.1
= control target key start
LH: loop header
LB: loop body
LE: loop exit
PB: predicated region body
PF: predicated region fallthrough
CT: control target
= control target key end

     0   :  { %15 = vsyncpa [#allocation7], 0  ;;  %s559_s0 = inlined_call_operand.hbm [shape: f32[2,8,128], index: 0, kind: input, shape index: {}]   ;;  %s560_s1 = inlined_call_operand.hbm [shape: f32[128,128], index: 1, kind: input, shape index: {}]   ;;  %s561_s2 = inlined_call_operand.vmem [shape: f32[1,128], index: 2, kind: input, shape index: {}]   ;;  %s562_s3 = inlined_call_operand.vmem [shape: f32[1,128], index: 3, kind: input, shape index: {}]   ;;  %s563_s4 = inlined_call_operand.hbm [shape: f32[128,128], index: 4, kind: input, shape index: {}]   ;;  %s564_s5 = inlined_call_operand.vmem [shape: f32[1,128], index: 5, kind: input, shape index: {}]   ;;  %s565_s6 = inlined_call_operand.vmem [shape: f32[1,128], index: 6, kind: input, shape index: {}]   ;;  %s566_s7 = inlined_call_operand.vmem [shape: f32[2,16], index: 7, kind: input, shape index: {}]   ;;  %s567_s8 = inlined_call_operand.<no memory space> [shape: f32[1,1], index: 8, kind: input, shape index: {}]   ;;  %s568_s9 = inlined_call_operand.hbm [shape: f32[2,128], index: 9, kind: output, shape index: {}]  }
   0x1   :  { %16 = vsyncpa [#allocation10], 0 }
   0x2   :  { %17 = vsyncpa [#allocation8], 0  ;;  %s35_s11 = sshll.u32 %s560_s1, 4  ;;  %s467_s12 = smov [#allocation9]   ;;  %s36_s11 = int_to_ptr.hbm [resolvable:$true] %s35_s11 }
   0x3   :  { %s37_s13 = sshll.u32 %s467_s12, 4  ;;  %s22_s16 = sshll.u32 %s559_s0, 4  ;;  %s38_s13 = int_to_ptr.vmem [resolvable:$true] %s37_s13  ;;  %s23_s16 = int_to_ptr.hbm [resolvable:$true] %s22_s16 }
   0x4   :  { %s468_s17 = smov 128   ;;  %s469_s18 = smov 8  }
   0x5   :  { %43 = dma.hbm_to_vmem [thread:$0]  %s36_s11, 2048, %s38_s13, [#allocation10], %s468_s17, %s468_s17, %s469_s18  }
   0x6   :  { %s470_s19 = smov [#allocation6]   ;;  %s52_s23 = sshll.u32 %s563_s4, 4  ;;  %s53_s23 = int_to_ptr.hbm [resolvable:$true] %s52_s23 }
   0x7   :  { %s24_s20 = sshll.u32 %s470_s19, 4  ;;  %s471_s1 = smov [#allocation11]   ;;  %s25_s20 = int_to_ptr.vmem [resolvable:$true] %s24_s20 }
   0x8   :  { %30 = dma.hbm_to_vmem [thread:$0]  %s23_s16, 256, %s25_s20, [#allocation7], %s468_s17, %s468_s17, %s469_s18  }
   0x9   :  { %s54_s24 = sshll.u32 %s471_s1, 4  ;;  %s55_s24 = int_to_ptr.vmem [resolvable:$true] %s54_s24 }
   0xa   :  { %60 = dma.hbm_to_vmem [thread:$0]  %s53_s23, 2048, %s55_s24, [#allocation10], %s468_s17, %s468_s17, %s469_s18  }
   0xb   :  { %461 = dma.done.wait [#allocation7], 256  }
   0xc   :  { %462 = vsyncadd [#allocation7], 4294967040 }
   0xd   :  { %463 = dma.done.wait [#allocation10], 4096  }
   0xe   :  { %464 = vsyncadd [#allocation10], 4294963200  ;;  %v98_v0 = vld [vmem:[#allocation9 + $0x78] sm:$0xff]  ;;  %v97_v1 = vld [vmem:[#allocation9 + $0x70] sm:$0xff]  ;;  %v472_v51 = vmov 0.0   ;;  %vm191_vm3 = vcmask 64512  }
   0xf   :  { %338 = vmatpush.msra.mxu3 %v98_v0  ;;  %99 = vmatpush.msra.mxu0 %v98_v0  ;;  %v96_v2 = vld [vmem:[#allocation9 + $0x68] sm:$0xff]  ;;  %v95_v3 = vld [vmem:[#allocation9 + $0x60] sm:$0xff]  ;;  %v94_v4 = vld [vmem:[#allocation9 + $0x58] sm:$0xff]  ;;  %177 = vst [vmem:[#allocation4] sm:$0xff] %v472_v51  ;;  %vm194_vm4 = vcmask 128000   ;;  %vm294_vm8 = vcmask 130048  }
  0x10   :  { %v93_v5 = vld [vmem:[#allocation9 + $0x50] sm:$0xff]  ;;  %v92_v6 = vld [vmem:[#allocation9 + $0x48] sm:$0xff]  ;;  %v91_v7 = vld [vmem:[#allocation9 + $0x40] sm:$0xff]  ;;  %178 = vst [vmem:[#allocation4 + $0x8] sm:$0xff] %v472_v51  ;;  %s473_s10 = smov [#allocation12]   ;;  %s326_s14 = sshll.u32 %s568_s9, 4  ;;  %s327_s14 = int_to_ptr.hbm [resolvable:$true] %s326_s14 }
  0x11   :  { %339 = vmatpush.msra.mxu3 %v97_v1  ;;  %100 = vmatpush.msra.mxu0 %v97_v1  ;;  %v90_v8 = vld [vmem:[#allocation9 + $0x38] sm:$0xff]  ;;  %v89_v9 = vld [vmem:[#allocation9 + $0x30] sm:$0xff]  ;;  %v88_v10 = vld [vmem:[#allocation9 + $0x28] sm:$0xff]  ;;  %s324_s11 = sshll.u32 %s473_s10, 4  ;;  %s325_s11 = int_to_ptr.vmem [resolvable:$true] %s324_s11 }
  0x12   :  { %v87_v11 = vld [vmem:[#allocation9 + $0x20] sm:$0xff]  ;;  %v86_v12 = vld [vmem:[#allocation9 + $0x18] sm:$0xff]  ;;  %v85_v13 = vld [vmem:[#allocation9 + $0x10] sm:$0xff] }
  0x13   :  { %340 = vmatpush.msra.mxu3 %v96_v2  ;;  %101 = vmatpush.msra.mxu0 %v96_v2  ;;  %v84_v14 = vld [vmem:[#allocation9 + $0x8] sm:$0xff]  ;;  %v83_v15 = vld [vmem:[#allocation9] sm:$0xff]  ;;  %v82_v16 = vld [vmem:[#allocation6 + $0x8] sm:$0xff] }
  0x14   :  { %v81_v17 = vld [vmem:[#allocation6] sm:$0xff]  ;;  %v214_v47 = vld [vmem:[#allocation11 + $0x78] sm:$0xff]  ;;  %v212_v52 = vld [vmem:[#allocation11 + $0x68] sm:$0xff] }
  0x15   :  { %341 = vmatpush.msra.mxu3 %v95_v3  ;;  %102 = vmatpush.msra.mxu0 %v95_v3  ;;  %v213_v48 = vld [vmem:[#allocation11 + $0x70] sm:$0xff]  ;;  %v211_v55 = vld [vmem:[#allocation11 + $0x60] sm:$0xff]  ;;  %v210_v59 = vld [vmem:[#allocation11 + $0x58] sm:$0xff] }
  0x16   :  { %v156_v50 = vld [vmem:[%s561_s2] sm:$0x1]  ;;  %215 = vmatpush.msra.mxu1 %v214_v47  ;;  %v208_v1 = vld [vmem:[#allocation11 + $0x48] sm:$0xff] }
  0x17   :  { %342 = vmatpush.msra.mxu3 %v94_v4  ;;  %103 = vmatpush.msra.mxu0 %v94_v4  ;;  %v158_v56 = vld [vmem:[%s562_s3] sm:$0x1]  ;;  %v207_v4 = vld [vmem:[#allocation11 + $0x40] sm:$0xff] }
  0x18   :  { %216 = vmatpush.msra.mxu1 %v213_v48  ;;  %v209_v61 = vld [vmem:[#allocation11 + $0x50] sm:$0xff] }
  0x19   :  { %343 = vmatpush.msra.mxu3 %v93_v5  ;;  %104 = vmatpush.msra.mxu0 %v93_v5 }
  0x1a   :  { %217 = vmatpush.msra.mxu1 %v212_v52 }
  0x1b   :  { %344 = vmatpush.msra.mxu3 %v92_v6  ;;  %105 = vmatpush.msra.mxu0 %v92_v6 }
  0x1c   :  { %218 = vmatpush.msra.mxu1 %v211_v55  ;;  %v272_v55 = vld [vmem:[%s564_s5] sm:$0x1] }
  0x1d   :  { %345 = vmatpush.msra.mxu3 %v91_v7  ;;  %106 = vmatpush.msra.mxu0 %v91_v7  ;;  %v206_v7 = vld [vmem:[#allocation11 + $0x38] sm:$0xff] }
  0x1e   :  { %219 = vmatpush.msra.mxu1 %v210_v59 }
  0x1f   :  { %346 = vmatpush.msra.mxu3 %v90_v8  ;;  %107 = vmatpush.msra.mxu0 %v90_v8  ;;  %v205_v8 = vld [vmem:[#allocation11 + $0x30] sm:$0xff] }
  0x20   :  { %220 = vmatpush.msra.mxu1 %v209_v61 }
  0x21   :  { %347 = vmatpush.msra.mxu3 %v89_v9  ;;  %108 = vmatpush.msra.mxu0 %v89_v9  ;;  %v204_v9 = vld [vmem:[#allocation11 + $0x28] sm:$0xff] }
  0x22   :  { %221 = vmatpush.msra.mxu1 %v208_v1 }
  0x23   :  { %348 = vmatpush.msra.mxu3 %v88_v10  ;;  %109 = vmatpush.msra.mxu0 %v88_v10 }
  0x24   :  { %222 = vmatpush.msra.mxu1 %v207_v4 }
  0x25   :  { %349 = vmatpush.msra.mxu3 %v87_v11  ;;  %110 = vmatpush.msra.mxu0 %v87_v11 }
  0x26   :  { %223 = vmatpush.msra.mxu1 %v206_v7 }
  0x27   :  { %350 = vmatpush.msra.mxu3 %v86_v12  ;;  %111 = vmatpush.msra.mxu0 %v86_v12  ;;  %v203_v12 = vld [vmem:[#allocation11 + $0x20] sm:$0xff] }
  0x28   :  { %224 = vmatpush.msra.mxu1 %v205_v8 }
  0x29   :  { %351 = vmatpush.msra.mxu3 %v85_v13  ;;  %112 = vmatpush.msra.mxu0 %v85_v13  ;;  %v202_v13 = vld [vmem:[#allocation11 + $0x18] sm:$0xff] }
  0x2a   :  { %225 = vmatpush.msra.mxu1 %v204_v9 }
  0x2b   :  { %352 = vmatpush.msra.mxu3 %v84_v14  ;;  %113 = vmatpush.msra.mxu0 %v84_v14  ;;  %v201_v14 = vld [vmem:[#allocation11 + $0x10] sm:$0xff] }
  0x2c   :  { %226 = vmatpush.msra.mxu1 %v203_v12 }
  0x2d   :  { %353 = vmatpush.msra.mxu3 %v83_v15  ;;  %114 = vmatpush.msra.mxu0 %v83_v15  ;;  %v200_v15 = vld [vmem:[#allocation11 + $0x8] sm:$0xff] }
  0x2e   :  { %118 = vmatmul.f32.vlgmr.msra.gmra.mxu3 %v82_v16  ;;  %115 = vmatmul.f32.vlgmr.msra.gmra.mxu0 %v81_v17  ;;  %v199_v16 = vld [vmem:[#allocation11] sm:$0xff] }
  0x2f   :  { %227 = vmatpush.msra.mxu1 %v202_v13 }
  0x31   :  { %228 = vmatpush.msra.mxu1 %v201_v14 }
  0x33   :  { %229 = vmatpush.msra.mxu1 %v200_v15 }
  0x35   :  { %230 = vmatpush.msra.mxu1 %v199_v16 }
  0xab   :  { %v116_v18 = vpop.f32.mrf.mxu0 }
  0xac   :  { %v131_v19 = vmul.f32 %v116_v18, %v116_v18 }
  0xb1   :  { %v119_v20 = vpop.f32.mrf.mxu3 }
  0xb2   :  { %v124_v21 = vadd.f32 %v119_v20, %v116_v18  ;;  %v132_v22 = vmul.f32 %v119_v20, %v119_v20 }
  0xb4   :  { %v125_v23 = vrot.slane %v124_v21, 4  ;;  %v133_v24 = vadd.f32 %v132_v22, %v131_v19 }
  0xb6   :  { %v126_v25 = vadd.f32 %v125_v23, %v124_v21  ;;  %v134_v26 = vrot.slane %v133_v24, 4 }
  0xb8   :  { %v127_v27 = vrot.slane %v126_v25, 2  ;;  %v135_v28 = vadd.f32 %v134_v26, %v133_v24 }
  0xba   :  { %v128_v29 = vadd.f32 %v127_v27, %v126_v25  ;;  %v136_v30 = vrot.slane %v135_v28, 2 }
  0xbc   :  { %v129_v31 = vrot.slane %v128_v29, 1  ;;  %v137_v32 = vadd.f32 %v136_v30, %v135_v28 }
  0xbe   :  { %v130_v33 = vadd.f32 %v129_v31, %v128_v29  ;;  %v138_v34 = vrot.slane %v137_v32, 1 }
  0xc0   :  { %v139_v35 = vadd.f32 %v138_v34, %v137_v32  ;;  %v140_v36 = vmul.f32 0.071428575, %v130_v33 }
  0xc2   :  { %v141_v37 = vmul.f32 0.071428575, %v139_v35  ;;  %v142_v38 = vmul.f32 %v140_v36, %v140_v36 }
  0xc4   :  { %v143_v39 = vsub.f32 %v141_v37, %v142_v38 }
  0xc6   :  { %v144_v40 = vmax.f32 %v143_v39, 0.0 }
  0xc8   :  { %v145_v41 = vadd.f32 1e-05, %v144_v40 }
  0xca   :  { %361 = vrsqrt.f32 %v145_v41  ;;  %vm152_vm1 = vweird.f32 %v145_v41 }
  0xd0   :  { %v362_v42 = vpop.eup %361 }
  0xd1   :  { %v147_v43 = vmul.f32 %v362_v42, %v145_v41  ;;  %vm153_vm0 = vweird.f32 %v362_v42 }
  0xd2   :  { %vm154_vm2 = vmor %vm152_vm1, %vm153_vm0 }
  0xd3   :  { %v148_v44 = vmul.f32 %v362_v42, %v147_v43 }
  0xd5   :  { %v149_v45 = vmul.f32 0.5, %v148_v44 }
  0xd7   :  { %v150_v46 = vsub.f32 1.5, %v149_v45 }
  0xd9   :  { %v151_v49 = vmul.f32 %v362_v42, %v150_v46 }
  0xdb   :  { %v155_v53 = vsel %vm154_vm2, %v362_v42, %v151_v49 }
  0xdc   :  { %v157_v54 = vmul.f32 %v156_v50, %v155_v53 }
  0xde   :  { %v159_v57 = vmul.f32 %v157_v54, %v140_v36  ;;  %v164_v58 = vperm.slane %v157_v54, 0 }
  0xe0   :  { %v160_v60 = vsub.f32 %v158_v56, %v159_v57  ;;  %v166_v62 = vmul.f32 %v164_v58, %v116_v18  ;;  %v167_v63 = vmul.f32 %v164_v58, %v119_v20  ;;  %v274_v58 = vld [vmem:[%s565_s6] sm:$0x1] }
  0xe2   :  { %v169_v0 = vperm.slane %v160_v60, 0 }
  0xe4   :  { %v171_v2 = vadd.f32 %v169_v0, %v166_v62  ;;  %v172_v3 = vadd.f32 %v169_v0, %v167_v63 }
  0xe6   :  { %v173_v5 = vmax.f32 %v171_v2, 0.0  ;;  %v174_v6 = vmax.f32 %v172_v3, 0.0 }
  0xe8   :  { %175 = vst [vmem:[#allocation2] sm:$0xff] %v173_v5  ;;  %v291_v5 = vld [vmem:[%s566_s7] sm:$0x3] }
  0xe9   :  { %176 = vst [vmem:[#allocation2 + $0x8] sm:$0xff] %v174_v6  ;;  %v293_v6 = vstv %s567_s8 }
  0xef   :  { %v181_v10 = vld [vmem:[#allocation2 + $0x1] sm:$0x3f] }
  0xf0   :  { %185 = vrot.lane.b32.xlu0 %v181_v10, %s469_s18  ;;  %v182_v11 = vld [vmem:[#allocation2 + $0x9] sm:$0x3f]  ;;  %v179_v18 = vld [vmem:[#allocation2] sm:$0x3f] }
  0xf1   :  { %v180_v20 = vld [vmem:[#allocation2 + $0x8] sm:$0x3f] }
  0xf8   :  { %187 = vrot.lane.b32.xlu0 %v182_v11, %s469_s18 }
 0x162   :  { %v186_v17 = vpop.permute.xlu0 %185 }
 0x163   :  { %v192_v19 = vsel %vm191_vm3, %v179_v18, %v186_v17 }
 0x164   :  { %195 = vst.msk [vmem:[#allocation4] sm:$0x3f] %vm194_vm4, %v192_v19 }
 0x16a   :  { %v188_v21 = vpop.permute.xlu0 %187 }
 0x16b   :  { %v193_v22 = vsel %vm191_vm3, %v180_v20, %v188_v21  ;;  %v197_v23 = vld [vmem:[#allocation4] sm:$0xff] }
 0x16c   :  { %196 = vst.msk [vmem:[#allocation4 + $0x8] sm:$0x3f] %vm194_vm4, %v193_v22  ;;  %231 = vmatmul.f32.vlgmr.msra.gmra.mxu1 %v197_v23 }
 0x173   :  { %v198_v24 = vld [vmem:[#allocation4 + $0x8] sm:$0xff] }
 0x174   :  { %234 = vmatmul.f32.gmra.mxu1 %v198_v24 }
 0x1e9   :  { %v232_v25 = vpop.f32.mrf.mxu1 }
 0x1ea   :  { %v247_v27 = vmul.f32 %v232_v25, %v232_v25 }
 0x1f1   :  { %v235_v26 = vpop.f32.mrf.mxu1 }
 0x1f2   :  { %v240_v28 = vadd.f32 %v235_v26, %v232_v25  ;;  %v248_v29 = vmul.f32 %v235_v26, %v235_v26 }
 0x1f4   :  { %v241_v30 = vrot.slane %v240_v28, 4  ;;  %v249_v31 = vadd.f32 %v248_v29, %v247_v27 }
 0x1f6   :  { %v242_v32 = vadd.f32 %v241_v30, %v240_v28  ;;  %v250_v33 = vrot.slane %v249_v31, 4 }
 0x1f8   :  { %v243_v34 = vrot.slane %v242_v32, 2  ;;  %v251_v35 = vadd.f32 %v250_v33, %v249_v31 }
 0x1fa   :  { %v244_v36 = vadd.f32 %v243_v34, %v242_v32  ;;  %v252_v37 = vrot.slane %v251_v35, 2 }
 0x1fc   :  { %v245_v38 = vrot.slane %v244_v36, 1  ;;  %v253_v39 = vadd.f32 %v252_v37, %v251_v35 }
 0x1fe   :  { %v246_v40 = vadd.f32 %v245_v38, %v244_v36  ;;  %v254_v41 = vrot.slane %v253_v39, 1 }
 0x200   :  { %v255_v42 = vadd.f32 %v254_v41, %v253_v39  ;;  %v256_v43 = vmul.f32 0.083333336, %v246_v40 }
 0x202   :  { %v257_v44 = vmul.f32 0.083333336, %v255_v42  ;;  %v258_v45 = vmul.f32 %v256_v43, %v256_v43 }
 0x204   :  { %v259_v46 = vsub.f32 %v257_v44, %v258_v45 }
 0x206   :  { %v260_v47 = vmax.f32 %v259_v46, 0.0 }
 0x208   :  { %v261_v48 = vadd.f32 1e-05, %v260_v47 }
 0x20a   :  { %363 = vrsqrt.f32 %v261_v48  ;;  %vm268_vm6 = vweird.f32 %v261_v48 }
 0x210   :  { %v364_v49 = vpop.eup %363 }
 0x211   :  { %v263_v50 = vmul.f32 %v364_v49, %v261_v48  ;;  %vm269_vm5 = vweird.f32 %v364_v49 }
 0x212   :  { %vm270_vm7 = vmor %vm268_vm6, %vm269_vm5 }
 0x213   :  { %v264_v51 = vmul.f32 %v364_v49, %v263_v50 }
 0x215   :  { %v265_v52 = vmul.f32 0.5, %v264_v51 }
 0x217   :  { %v266_v53 = vsub.f32 1.5, %v265_v52 }
 0x219   :  { %v267_v54 = vmul.f32 %v364_v49, %v266_v53 }
 0x21b   :  { %v271_v56 = vsel %vm270_vm7, %v364_v49, %v267_v54 }
 0x21c   :  { %v273_v57 = vmul.f32 %v272_v55, %v271_v56 }
 0x21e   :  { %v280_v59 = vperm.slane %v273_v57, 0  ;;  %v275_v60 = vmul.f32 %v273_v57, %v256_v43 }
 0x220   :  { %v276_v61 = vsub.f32 %v274_v58, %v275_v60  ;;  %v283_v62 = vmul.f32 %v280_v59, %v235_v26  ;;  %v282_v0 = vmul.f32 %v280_v59, %v232_v25 }
 0x222   :  { %v285_v63 = vperm.slane %v276_v61, 0 }
 0x224   :  { %v288_v1 = vadd.f32 %v285_v63, %v283_v62  ;;  %v287_v2 = vadd.f32 %v285_v63, %v282_v0 }
 0x226   :  { %v290_v3 = vmax.f32 %v288_v1, 0.0  ;;  %v289_v4 = vmax.f32 %v287_v2, 0.0 }
 0x228   :  { %312 = vmatpush.msra.mxu2 %v290_v3 }
 0x22a   :  { %313 = vmatpush.msra.mxu2 %v289_v4 }
 0x22b   :  { %337 = vmatmul.msk.f32.vlgmr.msra.gmra.mxu2 %vm294_vm8, %v291_v5 }
 0x2ae   :  { %v315_v7 = vpop.f32.mrf.mxu2 }
 0x2af   :  { %v316_v8 = vadd.f32 %v315_v7, %v293_v6 }
 0x2b1   :  { %318 = vst [vmem:[#allocation12] sm:$0x3] %v316_v8 }
 0x2b2   :  { %329 = dma.vmem_to_hbm [thread:$0]  %s325_s11, 32, %s327_s14, [#allocation8]  }
 0x2b3   :  { %465 = dma.done.wait [#allocation8], 32  }
 0x2b4   :  { %466 = vsyncadd [#allocation8], 4294967264 }
 0x2b5   :  { %334 = vsyncpa [#allocation7], 1 }
 0x2b6   :  { %335 = vsyncpa [#allocation10], 1 }
 0x2b7   :  { %336 = vsyncpa [#allocation8], 1 }

</bundles_post_ra>
